<compile_context>
chip_gen: v6e
topology: v6e:2x2x1
jax: 0.10.0
libtpu: 0.0.40
codegen_flags: <defaults>
</compile_context>

<pallas_src>
import numpy as np
import jax
import jax.numpy as jnp
from jax import lax
from jax.experimental import pallas as pl
from jax.experimental.pallas import tpu as pltpu


def _round_up(x, m):
    return ((x + m - 1) // m) * m


# ---------------------------------------------------------------------------
# Static masks (same construction as torch get_positive_and_negative_mask).
# ---------------------------------------------------------------------------
def get_positive_and_negative_mask(B, positive_nums):
    diag = np.eye(B, dtype=bool)
    oral = B // (positive_nums + 1)
    pos = np.zeros((B, B))
    for i in range(positive_nums + 1):
        pos += np.eye(B, B, k=oral * i)
        pos += np.eye(B, B, k=-oral * i)
    pos[diag] = 0
    neg = 1 - pos
    neg[diag] = 0
    return pos.astype(bool), neg.astype(bool)


# ---------------------------------------------------------------------------
# Kernel 1: row-wise L2 normalize, padding fused in (f32 in -> bf16 out).
# Reads the raw (B, D) input; writes the zero-padded (B_pad, D_pad) bf16 slab.
# ---------------------------------------------------------------------------
def _make_normalize_kernel(B, D, D_pad, tm):
    def kernel(x_ref, nrm_ref):
        i = pl.program_id(0)
        row_ids = i * tm + lax.broadcasted_iota(jnp.int32, (tm, 1), 0)
        # Rows beyond B are ragged-edge garbage -> zero them before any math.
        x = jnp.where(row_ids < B, x_ref[...], 0.0)
        sumsq = jnp.sum(x * x, axis=1, keepdims=True)
        # F.normalize(dim=1): x / max(||x||, 1e-12) == x * rsqrt(max(||x||^2, 1e-24))
        inv = lax.rsqrt(jnp.maximum(sumsq, 1e-24))
        y = (x * inv).astype(nrm_ref.dtype)             # (tm, D)
        if D_pad == D:
            nrm_ref[...] = y
        else:
            nrm_ref[...] = jnp.zeros((tm, D_pad), nrm_ref.dtype)
            nrm_ref[:, :D] = y                           # zero-fill padding lanes

    return kernel


def _normalize(x, B, B_pad, D, D_pad):
    tm = 256 if B_pad % 256 == 0 else 128
    kernel = _make_normalize_kernel(B, D, D_pad, tm)
    return pl.pallas_call(
        kernel,
        out_shape=jax.ShapeDtypeStruct((B_pad, D_pad), jnp.bfloat16),
        grid_spec=pltpu.PrefetchScalarGridSpec(
            num_scalar_prefetch=0,
            grid=(B_pad // tm,),
            in_specs=[pl.BlockSpec((tm, D), lambda i: (i, 0))],
            out_specs=pl.BlockSpec((tm, D_pad), lambda i: (i, 0)),
        ),
        compiler_params=pltpu.CompilerParams(
            dimension_semantics=("parallel",),
            vmem_limit_bytes=32 * 1024 * 1024,
        ),
    )(x.astype(jnp.float32))


# ---------------------------------------------------------------------------
# Kernel 2: tiled similarity + online masked log-softmax + per-row loss.
# ---------------------------------------------------------------------------
def _make_sim_kernel(B, oral, positive_nums, temperature, tm, tn):
    inv_t = float(1.0 / temperature)
    neg_big = -1e30  # Python literal (no captured jnp constants!)

    def kernel(q_ref, k_ref, sim_ref, rowloss_ref, m_sc, l_sc, p_sc):
        i = pl.program_id(0)
        j = pl.program_id(1)

        @pl.when(j == 0)
        def _init():
            m_sc[...] = jnp.full((tm, 1), neg_big, jnp.float32)
            l_sc[...] = jnp.zeros((tm, 1), jnp.float32)
            p_sc[...] = jnp.zeros((tm, 1), jnp.float32)

        # (tm, D) . (tn, D)^T via contraction of last dims — feeds the MXU
        # (bf16 operands, f32 accumulation), no materialized transpose.
        s = lax.dot_general(
            q_ref[...], k_ref[...],
            dimension_numbers=(((1,), (1,)), ((), ())),
            preferred_element_type=jnp.float32,
        )
        # bf16 sim tile: halves the dominant B_pad^2 HBM write.
        sim_ref[...] = s.astype(sim_ref.dtype)

        # Masks from 1-D iotas (O(tm)+O(tn) work, broadcast compare).
        row_ids = i * tm + lax.broadcasted_iota(jnp.int32, (tm, 1), 0)
        col_ids = j * tn + lax.broadcasted_iota(jnp.int32, (1, tn), 1)
        valid_col = col_ids < B                                   # mask padded cols
        off_diag = jnp.logical_and(row_ids != col_ids, valid_col)
        pos = jnp.logical_and(off_diag, (row_ids % oral) == (col_ids % oral))

        scaled = s * inv_t
        masked = jnp.where(off_diag, scaled, neg_big)
        tile_max = jnp.max(masked, axis=-1, keepdims=True)
        m_prev = m_sc[...]
        m_new = jnp.maximum(m_prev, tile_max)
        alpha = jnp.exp(m_prev - m_new)
        # Masked entries are -1e30 -> exp underflows to 0; saves one (tm,tn)
        # select per tile vs. a second jnp.where.  Safe: tile j==0 always has
        # >= 1 unmasked column per row, so m_new is finite from step 0.
        p_e = jnp.exp(masked - m_new)
        l_sc[...] = alpha * l_sc[...] + jnp.sum(p_e, axis=-1, keepdims=True)
        p_sc[...] = p_sc[...] + jnp.sum(jnp.where(pos, scaled, 0.0),
                                        axis=-1, keepdims=True)
        m_sc[...] = m_new

        @pl.when(j == pl.num_programs(1) - 1)
        def _finalize():
            lse = m_sc[...] + jnp.log(l_sc[...])
            # -sum_{positives} logprob (per row) = P*lse - sum_{positives} scaled
            rl = positive_nums * lse - p_sc[...]
            valid_row = row_ids < B
            rowloss_ref[...] = jnp.where(valid_row, rl, 0.0)

    return kernel


def _vmem_need(tm, tn, D_pad):
    # double-buffered bf16 q/k tiles + double-buffered bf16 sim out tile
    # + f32 rowloss tile + three (tm,1) f32 scratch accumulators
    return (2 * tm * D_pad * 2 + 2 * tn * D_pad * 2 +
            2 * tm * tn * 2 + 2 * tm * 4 + 3 * tm * 4)


def _choose_tiles(B, D_pad):
    if B <= 256:
        B_pad = _round_up(B, 128)
        # tm=128 gives 2 row tiles at B_pad=256 (both v7x TensorCores busy).
        return B_pad, 128, B_pad
    B_pad = _round_up(B, 256)        # tighter padding than rounding to 512
    tm, tn = 256, 256
    # On 128-MiB-VMEM parts (v5e/v6e) a bigger resident q tile halves the
    # k-stream re-read when D is large; keep it only inside a v7x-safe budget.
    if D_pad >= 2048 and B_pad % 512 == 0 and _vmem_need(512, tn, D_pad) <= 44 * 1024 * 1024:
        tm = 512
    return B_pad, tm, tn


# ---------------------------------------------------------------------------
# Forward wrapper.
# ---------------------------------------------------------------------------
def contrastive_weight_forward(x, temperature, positive_nums):
    B, D = x.shape
    P1 = positive_nums + 1
    # In-kernel residue mask == torch shifted-eye mask only when this holds.
    assert B % P1 == 0, "batch must equal oral_batch_size * (positive_nums + 1)"
    oral = B // P1

    D_pad = _round_up(D, 128)
    B_pad, tm, tn = _choose_tiles(B, D_pad)

    # Kernel 1: normalize + zero-pad fused (no jnp.pad HBM round trip).
    nrm = _normalize(x, B, B_pad, D, D_pad)          # (B_pad, D_pad) bf16

    kernel = _make_sim_kernel(B, oral, positive_nums, temperature, tm, tn)
    vmem_limit = int(min(max(int(1.25 * _vmem_need(tm, tn, D_pad)),
                             32 * 1024 * 1024), 48 * 1024 * 1024))
    sim_pad, rowloss = pl.pallas_call(
        kernel,
        out_shape=(
            jax.ShapeDtypeStruct((B_pad, B_pad), jnp.bfloat16),
            jax.ShapeDtypeStruct((B_pad, 1), jnp.float32),
        ),
        grid_spec=pltpu.PrefetchScalarGridSpec(
            num_scalar_prefetch=0,
            grid=(B_pad // tm, B_pad // tn),
            in_specs=[
                pl.BlockSpec((tm, D_pad), lambda i, j: (i, 0)),   # row (query) tile
                pl.BlockSpec((tn, D_pad), lambda i, j: (j, 0)),   # column tile
            ],
            out_specs=(
                pl.BlockSpec((tm, tn), lambda i, j: (i, j)),      # lane-dense sim tile
                pl.BlockSpec((tm, 1), lambda i, j: (i, 0)),       # per-row loss
            ),
            scratch_shapes=[
                pltpu.VMEM((tm, 1), jnp.float32),   # running max
                pltpu.VMEM((tm, 1), jnp.float32),   # running sum of exp
                pltpu.VMEM((tm, 1), jnp.float32),   # running positive-logit sum
            ],
        ),
        compiler_params=pltpu.CompilerParams(
            dimension_semantics=("parallel", "arbitrary"),
            vmem_limit_bytes=vmem_limit,
        ),
    )(nrm, nrm)

    sim = sim_pad[:B, :B]
    loss = jnp.sum(rowloss) / float(B)      # padded rows contribute exactly 0

    # --- [positives | negatives] re-ordering (structured, no B^2 gather) ----
    # column c = blk*oral + res ; positives of row r are its residue class.
    sim3 = sim.reshape(B, P1, oral)
    res = (jnp.arange(B, dtype=jnp.int32) % oral)
    blk = (jnp.arange(B, dtype=jnp.int32) // oral)

    # positives including the diagonal, ascending column order
    pos_self = jnp.take_along_axis(sim3, res[:, None, None], axis=2)[..., 0]  # (B, P1)
    pidx = jnp.arange(P1 - 1, dtype=jnp.int32)[None, :]
    pidx = pidx + (pidx >= blk[:, None]).astype(jnp.int32)                    # skip diag
    positives = jnp.take_along_axis(pos_self, pidx, axis=1)                   # (B, P)

    # negatives: drop the row's residue column inside every block, ascending order
    nidx = jnp.arange(oral - 1, dtype=jnp.int32)[None, :]
    nidx = nidx + (nidx >= res[:, None]).astype(jnp.int32)                    # (B, oral-1)
    negatives = jnp.take_along_axis(sim3, nidx[:, None, :], axis=2)           # (B, P1, oral-1)
    negatives = negatives.reshape(B, P1 * (oral - 1))

    logits = jnp.concatenate([positives, negatives], axis=-1)                 # (B, B-1)

    pos_mask_np, _ = get_positive_and_negative_mask(B, positive_nums)
    return loss, sim, logits, jnp.asarray(pos_mask_np)


# ---------------------------------------------------------------------------
# Pure-JAX reference (mirrors the torch module exactly, f32).
# ---------------------------------------------------------------------------
def reference_forward(x, temperature, positive_nums):
    B = x.shape[0]
    nrm = x / jnp.maximum(jnp.linalg.norm(x, axis=1, keepdims=True), 1e-12)
    sim = nrm @ nrm.T
    pos_mask, neg_mask = get_positive_and_negative_mask(B, positive_nums)
    positives = sim[np.asarray(pos_mask)].reshape(B, -1)
    negatives = sim[np.asarray(neg_mask)].reshape(B, -1)
    logits = jnp.concatenate([positives, negatives], axis=-1)
    predict = jax.nn.log_softmax(logits / temperature, axis=-1)
    P = positives.shape[-1]
    # KLDivLoss(batchmean) with targets = [ones(P), zeros(rest)]
    loss = -jnp.sum(predict[:, :P]) / B
    return loss, sim, logits


if __name__ == "__main__":
    temperature = 0.2
    positive_nums = 3
    oral_batch = 2
    B = oral_batch * (positive_nums + 1)   # 8
    D = 32

    key = jax.random.PRNGKey(0)
    x = jax.random.normal(key, (B, D), dtype=jnp.float32)

    loss, sim, logits, pos_mask = contrastive_weight_forward(
        x, temperature, positive_nums
    )
    jax.block_until_ready((loss, sim, logits, pos_mask))

    ref_loss, ref_sim, ref_logits = reference_forward(x, temperature, positive_nums)

    # bf16 MXU operands + bf16 sim/logits output (loss accumulated in f32)
    # -> tolerances relaxed to bf16 level vs. the f32 reference.
    sim_f32 = np.asarray(sim).astype(np.float32)
    logits_f32 = np.asarray(logits).astype(np.float32)
    assert np.allclose(sim_f32, np.asarray(ref_sim), atol=1.5e-2, rtol=1.5e-2)
    assert np.allclose(logits_f32, np.asarray(ref_logits), atol=1.5e-2, rtol=1.5e-2)
    assert np.allclose(float(loss), float(ref_loss), atol=5e-2, rtol=2e-2)

    print("KERNEL_OK")
</pallas_src>

<mosaic_0001>
module attributes {stable_mosaic.version = 11 : i64} {
  func.func @kernel(%arg0: i32, %arg1: memref<128x32xf32, #tpu.memory_space<vmem>>, %arg2: memref<128x128xbf16, #tpu.memory_space<vmem>>) attributes {dimension_semantics = [#tpu.dimension_semantics<parallel>], iteration_bounds = array<i64: 1>, scalar_prefetch = 0 : i64, scratch_operands = 0 : i64, tpu.core_type = #tpu.core_type<tc>, window_params = [{transform_indices = @transform_0, window_bounds = array<i64: 128, 32>}, {transform_indices = @transform_1, window_bounds = array<i64: 128, 128>}]} {
    %c128_i32 = arith.constant 128 : i32
    %0 = arith.muli %arg0, %c128_i32 : i32
    %1 = tpu.iota {dimensions = array<i32: 0>} : vector<128x1xi32>
    %2 = vector.broadcast %0 : i32 to vector<128x1xi32>
    %3 = arith.addi %2, %1 : vector<128x1xi32>
    %c8_i32 = arith.constant 8 : i32
    %4 = vector.broadcast %c8_i32 : i32 to vector<128x1xi32>
    %5 = arith.cmpi slt, %3, %4 : vector<128x1xi32>
    %c0 = arith.constant 0 : index
    %c0_0 = arith.constant 0 : index
    %6 = vector.load %arg1[%c0, %c0_0] : memref<128x32xf32, #tpu.memory_space<vmem>>, vector<128x32xf32>
    %cst = arith.constant 0.000000e+00 : f32
    %7 = vector.shape_cast %5 : vector<128x1xi1> to vector<128x1xi1>
    %8 = vector.broadcast %7 : vector<128x1xi1> to vector<128x32xi1>
    %9 = vector.broadcast %cst : f32 to vector<128x32xf32>
    %10 = arith.select %8, %6, %9 : vector<128x32xi1>, vector<128x32xf32>
    %11 = arith.mulf %10, %10 : vector<128x32xf32>
    %cst_1 = arith.constant dense<0.000000e+00> : vector<128xf32>
    %12 = vector.multi_reduction <add>, %11, %cst_1 [1] : vector<128x32xf32> to vector<128xf32>
    %13 = vector.shape_cast %12 : vector<128xf32> to vector<128x1xf32>
    %cst_2 = arith.constant 1.000000e-24 : f32
    %14 = vector.broadcast %cst_2 : f32 to vector<128x1xf32>
    %15 = arith.maximumf %13, %14 : vector<128x1xf32>
    %16 = math.rsqrt %15 : vector<128x1xf32>
    %17 = vector.broadcast %16 : vector<128x1xf32> to vector<128x32xf32>
    %18 = arith.mulf %10, %17 : vector<128x32xf32>
    %19 = arith.truncf %18 : vector<128x32xf32> to vector<128x32xbf16>
    %cst_3 = arith.constant 0.000000e+00 : bf16
    %20 = vector.broadcast %cst_3 : bf16 to vector<128x128xbf16>
    %c0_4 = arith.constant 0 : index
    %c0_5 = arith.constant 0 : index
    %21 = vector.load %arg2[%c0_4, %c0_5] : memref<128x128xbf16, #tpu.memory_space<vmem>>, vector<128x128xbf16>
    tpu.vector_store %arg2[%c0_4, %c0_5], %20 {strides = array<i32>} : memref<128x128xbf16, #tpu.memory_space<vmem>>, vector<128x128xbf16>,
    %c0_6 = arith.constant 0 : index
    %c0_7 = arith.constant 0 : index
    %22 = vector.load %arg2[%c0_6, %c0_7] : memref<128x128xbf16, #tpu.memory_space<vmem>>, vector<128x32xbf16>
    tpu.vector_store %arg2[%c0_6, %c0_7], %19 {strides = array<i32>} : memref<128x128xbf16, #tpu.memory_space<vmem>>, vector<128x32xbf16>,
    return
  }
  func.func @transform_0(%arg0: i32) -> (i32, i32) {
    %c0_i32 = arith.constant 0 : i32
    %c0_i32_0 = arith.constant 0 : i32
    return %arg0, %c0_i32 : i32, i32
  }
  func.func @transform_1(%arg0: i32) -> (i32, i32) {
    %c0_i32 = arith.constant 0 : i32
    %c0_i32_0 = arith.constant 0 : i32
    return %arg0, %c0_i32 : i32, i32
  }
}

</mosaic_0001>

<bundles_post_ra>
// kernel: tpu_custom_call.1
= control target key start
LH: loop header
LB: loop body
LE: loop exit
PB: predicated region body
PF: predicated region fallthrough
CT: control target
= control target key end

     0   :  { %6 = vsyncpa [#allocation3], 0  ;;  %s527_s0 = inlined_call_operand.hbm [shape: f32[8,32], index: 0, kind: input, shape index: {}]   ;;  %s528_s1 = inlined_call_operand.hbm [shape: bf16[128,128], index: 1, kind: output, shape index: {}]  }
   0x1   :  { %7 = vsyncpa [#allocation4], 0 }
   0x2   :  { %12 = vsyncadd [#allocation3], 1920  ;;  %s482_s6 = smov [#allocation2]  }
   0x3   :  { %s13_s7 = sshll.u32 %s482_s6, 4  ;;  %s14_s7 = int_to_ptr.vmem [resolvable:$true] %s13_s7 }
   0x4   :  { %s446_s8 = scalar_lea.vmem %s14_s7, 128  ;;  %s450_s9 = scalar_lea.vmem %s14_s7, 2048 }
   0x5   :  { %p447_p0 = scmp.ne.s32.totalorder %s14_s7, %s446_s8  ;;  %p451_p1 = scmp.lt.s32.totalorder %s14_s7, %s14_s7 }
   0x6   :  { %p452_p2 = scmp.lt.s32.totalorder %s450_s9, %s446_s8 }
   0x8   :  { %p453_p3 = por %p452_p2, %p451_p1 }
   0xa   :  { %p454_p4 = pnand %p453_p3, %p447_p0 }
   0xc   :  { %457 = shalt.err (!%p454_p4)
}
   0xd   :  { %s483_s10 = smov 128   ;;  %s484_s11 = smov 8  }
   0xe   :  { %19 = dma.hbm_to_vmem [thread:$0]  %s527_s0, 128, %s14_s7, [#allocation3], %s483_s10, %s483_s10, %s484_s11  }
   0xf   :  { %478 = dma.done.wait [#allocation3], 2048  }
  0x10   :  { %479 = vsyncadd [#allocation3], 4294965248  ;;  %v485_v0 = vmov 0.0   ;;  %v486_v1 = vmov 0   ;;  %v503_v2 = vld [vmem:[#allocation2] sm:$0xff]  ;;  %vm155_vm0 = vcmask 261120  }
  0x11   :  { %163 = vadd.xlane.f32.xlu1 %v485_v0  ;;  %160 = vadd.xlane.f32.xlu0 %v485_v0  ;;  %262 = vst [vmem:[#allocation5 + $0x8] sm:$0xf] %v486_v1  ;;  %260 = vst [vmem:[#allocation5] sm:$0xf] %v486_v1  ;;  %v139_v3 = vmul.f32 %v503_v2, %v503_v2  ;;  %vm332_vm1 = vcmask 257024   ;;  %s487_s0 = smov [#allocation5]  }
  0x12   :  { %261 = vst [vmem:[#allocation5 + $0x4] sm:$0xf] %v486_v1  ;;  %263 = vst [vmem:[#allocation5 + $0xc] sm:$0xf] %v486_v1  ;;  %s354_s14 = sshll.u32 %s487_s0, 4  ;;  %s355_s14 = int_to_ptr.vmem [resolvable:$true] %s354_s14 }
  0x13   :  { %264 = vst [vmem:[#allocation5 + $0x10] sm:$0xf] %v486_v1  ;;  %265 = vst [vmem:[#allocation5 + $0x14] sm:$0xf] %v486_v1  ;;  %v156_v4 = vsel %vm155_vm0, %v139_v3, 0.0  ;;  %s458_s15 = scalar_lea.vmem %s355_s14, 1024  ;;  %p463_p6 = scmp.lt.s32.totalorder %s355_s14, %s355_s14 }
  0x14   :  { %266 = vst [vmem:[#allocation5 + $0x18] sm:$0xf] %v486_v1  ;;  %267 = vst [vmem:[#allocation5 + $0x1c] sm:$0xf] %v486_v1  ;;  %p459_p5 = scmp.ne.s32.totalorder %s355_s14, %s458_s15  ;;  %p464_p7 = scmp.lt.s32.totalorder %s458_s15, %s458_s15 }
  0x15   :  { %268 = vst [vmem:[#allocation5 + $0x20] sm:$0xf] %v486_v1  ;;  %269 = vst [vmem:[#allocation5 + $0x24] sm:$0xf] %v486_v1  ;;  %166 = vadd.xlane.f32.xlu1 %v485_v0  ;;  %169 = vadd.xlane.f32.xlu0 %v485_v0 }
  0x16   :  { %270 = vst [vmem:[#allocation5 + $0x28] sm:$0xf] %v486_v1  ;;  %271 = vst [vmem:[#allocation5 + $0x2c] sm:$0xf] %v486_v1  ;;  %p465_p8 = por %p464_p7, %p463_p6 }
  0x17   :  { %272 = vst [vmem:[#allocation5 + $0x30] sm:$0xf] %v486_v1  ;;  %273 = vst [vmem:[#allocation5 + $0x34] sm:$0xf] %v486_v1 }
  0x18   :  { %274 = vst [vmem:[#allocation5 + $0x38] sm:$0xf] %v486_v1  ;;  %275 = vst [vmem:[#allocation5 + $0x3c] sm:$0xf] %v486_v1  ;;  %p466_p9 = pnand %p465_p8, %p459_p5 }
  0x19   :  { %172 = vadd.xlane.f32.xlu1 %v485_v0  ;;  %157 = vadd.xlane.f32.xlu0 %v156_v4 }
  0x1d   :  { %178 = vadd.xlane.f32.xlu1 %v485_v0  ;;  %175 = vadd.xlane.f32.xlu0 %v485_v0 }
  0x21   :  { %184 = vadd.xlane.f32.xlu1 %v485_v0  ;;  %181 = vadd.xlane.f32.xlu0 %v485_v0 }
  0x25   :  { %190 = vadd.xlane.f32.xlu1 %v485_v0  ;;  %187 = vadd.xlane.f32.xlu0 %v485_v0 }
  0x29   :  { %196 = vadd.xlane.f32.xlu1 %v485_v0  ;;  %193 = vadd.xlane.f32.xlu0 %v485_v0 }
  0x2d   :  { %202 = vadd.xlane.f32.xlu1 %v485_v0  ;;  %199 = vadd.xlane.f32.xlu0 %v485_v0 }
  0x9a   :  { %v164_v5 = vpop.xlane.xlu1 %163  ;;  %v161_v6 = vpop.xlane.xlu0 %160 }
  0x9b   :  { %v206_v7 = vmax.f32 %v164_v5, 1e-24  ;;  %v205_v8 = vmax.f32 %v161_v6, 1e-24 }
  0x9d   :  { %406 = vrsqrt.f32 %v206_v7 }
  0x9e   :  { %408 = vrsqrt.f32 %v205_v8  ;;  %v167_v9 = vpop.xlane.xlu1 %166  ;;  %v170_v10 = vpop.xlane.xlu0 %169 }
  0x9f   :  { %v207_v11 = vmax.f32 %v167_v9, 1e-24  ;;  %v208_v12 = vmax.f32 %v170_v10, 1e-24 }
  0xa1   :  { %410 = vrsqrt.f32 %v207_v11 }
  0xa2   :  { %412 = vrsqrt.f32 %v208_v12  ;;  %v173_v13 = vpop.xlane.xlu1 %172  ;;  %v158_v15 = vpop.xlane.xlu0 %157 }
  0xa3   :  { %v209_v14 = vmax.f32 %v173_v13, 1e-24  ;;  %v204_v16 = vmax.f32 %v158_v15, 1e-24 }
  0xa5   :  { %414 = vrsqrt.f32 %v209_v14 }
  0xa6   :  { %v179_v17 = vpop.xlane.xlu1 %178  ;;  %416 = vrsqrt.f32 %v204_v16  ;;  %v176_v19 = vpop.xlane.xlu0 %175 }
  0xa7   :  { %v211_v18 = vmax.f32 %v179_v17, 1e-24  ;;  %v210_v20 = vmax.f32 %v176_v19, 1e-24 }
  0xa9   :  { %418 = vrsqrt.f32 %v211_v18 }
  0xaa   :  { %v407_v21 = vpop.eup %406  ;;  %v185_v22 = vpop.xlane.xlu1 %184  ;;  %420 = vrsqrt.f32 %v210_v20 }
  0xab   :  { %v409_v23 = vpop.eup %408  ;;  %v238_v24 = vmul.f32 0.0, %v407_v21  ;;  %v213_v25 = vmax.f32 %v185_v22, 1e-24  ;;  %v182_v27 = vpop.xlane.xlu0 %181 }
  0xac   :  { %v237_v26 = vmul.f32 0.0, %v409_v23  ;;  %v212_v29 = vmax.f32 %v182_v27, 1e-24 }
  0xad   :  { %v384_v28 = vpack.c.bf16 %v238_v24, %v238_v24  ;;  %422 = vrsqrt.f32 %v213_v25 }
  0xae   :  { %v411_v30 = vpop.eup %410  ;;  %v383_v31 = vpack.c.bf16 %v237_v26, %v237_v26  ;;  %v191_v32 = vpop.xlane.xlu1 %190  ;;  %424 = vrsqrt.f32 %v212_v29 }
  0xaf   :  { %v413_v33 = vpop.eup %412  ;;  %335 = vst.msk [vmem:[#allocation5 + $0x8] sm:$0xf] %vm332_vm1, %v384_v28  ;;  %v239_v34 = vmul.f32 0.0, %v411_v30  ;;  %v215_v35 = vmax.f32 %v191_v32, 1e-24  ;;  %v188_v37 = vpop.xlane.xlu0 %187 }
  0xb0   :  { %334 = vst.msk [vmem:[#allocation5 + $0x4] sm:$0xf] %vm332_vm1, %v383_v31  ;;  %v240_v36 = vmul.f32 0.0, %v413_v33  ;;  %v214_v39 = vmax.f32 %v188_v37, 1e-24 }
  0xb1   :  { %v385_v38 = vpack.c.bf16 %v239_v34, %v239_v34  ;;  %426 = vrsqrt.f32 %v215_v35 }
  0xb2   :  { %v415_v40 = vpop.eup %414  ;;  %v386_v41 = vpack.c.bf16 %v240_v36, %v240_v36  ;;  %v197_v42 = vpop.xlane.xlu1 %196  ;;  %428 = vrsqrt.f32 %v214_v39 }
  0xb3   :  { %336 = vst.msk [vmem:[#allocation5 + $0xc] sm:$0xf] %vm332_vm1, %v385_v38  ;;  %v241_v43 = vmul.f32 0.0, %v415_v40  ;;  %v217_v44 = vmax.f32 %v197_v42, 1e-24  ;;  %v417_v45 = vpop.eup %416  ;;  %v194_v46 = vpop.xlane.xlu0 %193 }
  0xb4   :  { %337 = vst.msk [vmem:[#allocation5 + $0x10] sm:$0xf] %vm332_vm1, %v386_v41  ;;  %v236_v48 = vmul.f32 %v417_v45, %v503_v2  ;;  %v216_v49 = vmax.f32 %v194_v46, 1e-24 }
  0xb5   :  { %v387_v47 = vpack.c.bf16 %v241_v43, %v241_v43  ;;  %430 = vrsqrt.f32 %v217_v44 }
  0xb6   :  { %v419_v50 = vpop.eup %418  ;;  %v203_v51 = vpop.xlane.xlu1 %202  ;;  %v382_v52 = vpack.c.bf16 %v236_v48, %v236_v48  ;;  %432 = vrsqrt.f32 %v216_v49 }
  0xb7   :  { %338 = vst.msk [vmem:[#allocation5 + $0x14] sm:$0xf] %vm332_vm1, %v387_v47  ;;  %v243_v53 = vmul.f32 0.0, %v419_v50  ;;  %v219_v54 = vmax.f32 %v203_v51, 1e-24  ;;  %v421_v55 = vpop.eup %420  ;;  %v200_v56 = vpop.xlane.xlu0 %199 }
  0xb8   :  { %333 = vst.msk [vmem:[#allocation5] sm:$0xf] %vm332_vm1, %v382_v52  ;;  %v242_v58 = vmul.f32 0.0, %v421_v55  ;;  %v218_v59 = vmax.f32 %v200_v56, 1e-24 }
  0xb9   :  { %v389_v57 = vpack.c.bf16 %v243_v53, %v243_v53  ;;  %434 = vrsqrt.f32 %v219_v54 }
  0xba   :  { %v423_v60 = vpop.eup %422  ;;  %v388_v61 = vpack.c.bf16 %v242_v58, %v242_v58  ;;  %436 = vrsqrt.f32 %v218_v59 }
  0xbb   :  { %340 = vst.msk [vmem:[#allocation5 + $0x1c] sm:$0xf] %vm332_vm1, %v389_v57  ;;  %v245_v62 = vmul.f32 0.0, %v423_v60  ;;  %v425_v63 = vpop.eup %424 }
  0xbc   :  { %339 = vst.msk [vmem:[#allocation5 + $0x18] sm:$0xf] %vm332_vm1, %v388_v61  ;;  %v244_v1 = vmul.f32 0.0, %v425_v63 }
  0xbd   :  { %v391_v0 = vpack.c.bf16 %v245_v62, %v245_v62 }
  0xbe   :  { %v427_v2 = vpop.eup %426  ;;  %v390_v3 = vpack.c.bf16 %v244_v1, %v244_v1 }
  0xbf   :  { %342 = vst.msk [vmem:[#allocation5 + $0x24] sm:$0xf] %vm332_vm1, %v391_v0  ;;  %v247_v4 = vmul.f32 0.0, %v427_v2  ;;  %v429_v5 = vpop.eup %428 }
  0xc0   :  { %341 = vst.msk [vmem:[#allocation5 + $0x20] sm:$0xf] %vm332_vm1, %v390_v3  ;;  %v246_v7 = vmul.f32 0.0, %v429_v5 }
  0xc1   :  { %v393_v6 = vpack.c.bf16 %v247_v4, %v247_v4 }
  0xc2   :  { %v431_v8 = vpop.eup %430  ;;  %v392_v9 = vpack.c.bf16 %v246_v7, %v246_v7 }
  0xc3   :  { %344 = vst.msk [vmem:[#allocation5 + $0x2c] sm:$0xf] %vm332_vm1, %v393_v6  ;;  %v249_v10 = vmul.f32 0.0, %v431_v8  ;;  %v433_v11 = vpop.eup %432 }
  0xc4   :  { %343 = vst.msk [vmem:[#allocation5 + $0x28] sm:$0xf] %vm332_vm1, %v392_v9  ;;  %v248_v13 = vmul.f32 0.0, %v433_v11 }
  0xc5   :  { %v395_v12 = vpack.c.bf16 %v249_v10, %v249_v10 }
  0xc6   :  { %v435_v14 = vpop.eup %434  ;;  %v394_v15 = vpack.c.bf16 %v248_v13, %v248_v13 }
  0xc7   :  { %346 = vst.msk [vmem:[#allocation5 + $0x34] sm:$0xf] %vm332_vm1, %v395_v12  ;;  %v251_v16 = vmul.f32 0.0, %v435_v14  ;;  %v437_v17 = vpop.eup %436 }
  0xc8   :  { %345 = vst.msk [vmem:[#allocation5 + $0x30] sm:$0xf] %vm332_vm1, %v394_v15  ;;  %v250_v19 = vmul.f32 0.0, %v437_v17 }
  0xc9   :  { %v397_v18 = vpack.c.bf16 %v251_v16, %v251_v16 }
  0xca   :  { %v396_v20 = vpack.c.bf16 %v250_v19, %v250_v19 }
  0xcb   :  { %348 = vst.msk [vmem:[#allocation5 + $0x3c] sm:$0xf] %vm332_vm1, %v397_v18 }
  0xcc   :  { %347 = vst.msk [vmem:[#allocation5 + $0x38] sm:$0xf] %vm332_vm1, %v396_v20 }
  0xcd   :  { %469 = shalt.err (!%p466_p9)
}
  0xce   :  { %s488_s16 = smov 64   ;;  %s489_s17 = smov 4  }
  0xcf   :  { %360 = dma.vmem_to_hbm [thread:$0]  %s355_s14, 1024, %s528_s1, [#allocation4], %s488_s16, %s488_s16, %s489_s17  }
  0xd0   :  { %480 = dma.done.wait [#allocation4], 1024  }
  0xd1   :  { %481 = vsyncadd [#allocation4], 4294966272 }
  0xd2   :  { %364 = vsyncpa [#allocation3], 1 }
  0xd3   :  { %365 = vsyncpa [#allocation4], 1 }

</bundles_post_ra>
